<compile_context>
chip_gen: v7x
topology: tpu7x:2x2x1
jax: 0.10.0
libtpu: 0.0.40
codegen_flags: <defaults>
</compile_context>

<pallas_src>
import math

import jax
import jax.numpy as jnp
from jax.experimental import pallas as pl
from jax.experimental.pallas import tpu as pltpu


def _round_up(x, m):
    return ((x + m - 1) // m) * m


def _cdiv(a, b):
    return -(-a // b)


# ---------------------------------------------------------------------------
# Fused kernel:  out[i-tile, :] = sum_k  A[i-tile, k-tile] @ (X[k-tile] @ W) + b
# ---------------------------------------------------------------------------
def _gcn_fused_kernel(adj_ref, x_ref, w_ref, b_ref, o_ref):
    k = pl.program_id(1)

    @pl.when(k == 0)
    def _():
        # Output block is VMEM-resident across k: initialize with the bias.
        o_ref[...] = jnp.broadcast_to(b_ref[...], o_ref.shape)

    # Tiny per-step support tile (k_tile x in_dim @ in_dim x out_pad), f32.
    s = jnp.dot(x_ref[...], w_ref[...], preferred_element_type=jnp.float32)

    # Dominant matmul: bf16 MXU feed, f32 accumulation straight into o_ref.
    o_ref[...] += jnp.dot(
        adj_ref[...], s.astype(jnp.bfloat16), preferred_element_type=jnp.float32
    )


# ---------------------------------------------------------------------------
# Planning helpers (tile sizes, per-generation VMEM budget, padded extents)
# ---------------------------------------------------------------------------
def _vmem_budget_bytes():
    try:
        cap = pltpu.get_tpu_info().vmem_capacity_bytes
    except Exception:
        cap = 64 * 1024 * 1024  # conservative fallback (v7x per-TC size)
    # Leave headroom for compiler-internal scratch; hard cap at 100 MiB.
    return min(int(cap * 0.7), 100 * 1024 * 1024)


def _balanced_tile(n, max_tile, align):
    """Largest tile <= max_tile splitting n into equal-ish aligned pieces."""
    max_tile = max(align, min(_round_up(max_tile, align), _round_up(n, align)))
    n_tiles = _cdiv(n, max_tile)
    return _round_up(_cdiv(n, n_tiles), align)


def gcn_plan(n_nodes, input_dim, output_dim, *, row_tile=1024, k_tile=1024):
    out_pad = _round_up(output_dim, 128)
    budget = _vmem_budget_bytes()

    rt = _balanced_tile(n_nodes, row_tile, 8)
    kt = _balanced_tile(n_nodes, k_tile, 128)

    def footprint(rt_, kt_):
        adj = 2 * rt_ * kt_ * 2               # bf16 adjacency, double-buffered
        x = 2 * kt_ * input_dim * 4           # f32 features, double-buffered
        w = 2 * input_dim * out_pad * 4       # resident weight (count 2x, safe)
        b = 2 * out_pad * 4                   # bias row
        out = 2 * rt_ * out_pad * 4           # resident f32 output block
        return adj + x + w + b + out

    # Shrink tiles until the double-buffered footprint fits the budget
    # (matters on v7x: 64 MiB physical vs 128 MiB on v5e/v6e).
    while footprint(rt, kt) > budget and (rt > 128 or kt > 128):
        if rt >= kt and rt > 128:
            rt = max(8, _round_up(rt // 2, 8))
        elif kt > 128:
            kt = max(128, _round_up(kt // 2, 128))
        else:
            break

    n_rows = _round_up(n_nodes, rt)
    n_k = _round_up(n_nodes, kt)
    vmem_limit = min(budget, footprint(rt, kt) + (16 << 20))
    return dict(
        n_nodes=n_nodes, input_dim=input_dim, output_dim=output_dim,
        out_pad=out_pad, row_tile=rt, k_tile=kt,
        n_rows=n_rows, n_k=n_k, vmem_limit_bytes=int(vmem_limit),
    )


def prepare_adjacency(adjacency, plan):
    """Cast/pad the adjacency to the kernel's bf16 layout ONCE.

    GCNs reuse the same adjacency for every layer/step; caching this result
    amortizes the f32->bf16 pad/cast pre-pass across calls.
    """
    N = plan["n_nodes"]
    n_rows, n_k = plan["n_rows"], plan["n_k"]
    adj = adjacency.astype(jnp.bfloat16)
    if adjacency.shape != (n_rows, n_k):
        adj = jnp.zeros((n_rows, n_k), jnp.bfloat16).at[:N, :N].set(adj)
    return adj


# ---------------------------------------------------------------------------
# Public wrapper
# ---------------------------------------------------------------------------
def graph_convolution(adjacency, input_feature, weight, bias=None, *,
                      plan=None, row_tile=1024, k_tile=1024):
    """L * X * theta (+ bias) as one fused Pallas call.

    `adjacency` may be either the raw (N, N) matrix or the result of
    prepare_adjacency(adjacency, plan) to amortize the cast/pad across calls.
    """
    N, in_dim = input_feature.shape
    in_dim_w, out_dim = weight.shape
    assert in_dim == in_dim_w

    if plan is None:
        plan = gcn_plan(N, in_dim, out_dim, row_tile=row_tile, k_tile=k_tile)
    out_pad, rt, kt = plan["out_pad"], plan["row_tile"], plan["k_tile"]
    n_rows, n_k = plan["n_rows"], plan["n_k"]

    if adjacency.dtype == jnp.bfloat16 and adjacency.shape == (n_rows, n_k):
        adj_p = adjacency                      # already prepared / cached
    else:
        assert adjacency.shape == (N, N)
        adj_p = prepare_adjacency(adjacency, plan)

    f32 = jnp.float32
    x_p = input_feature.astype(f32)
    if n_k != N:
        x_p = jnp.zeros((n_k, in_dim), f32).at[:N, :].set(x_p)
    w_p = weight.astype(f32)
    if out_pad != out_dim:
        w_p = jnp.zeros((in_dim, out_pad), f32).at[:, :out_dim].set(w_p)
    if bias is None:
        b_p = jnp.zeros((1, out_pad), f32)
    else:
        b_p = jnp.zeros((1, out_pad), f32).at[0, :out_dim].set(bias.astype(f32))

    out = pl.pallas_call(
        _gcn_fused_kernel,
        out_shape=jax.ShapeDtypeStruct((n_rows, out_pad), f32),
        grid_spec=pltpu.PrefetchScalarGridSpec(
            num_scalar_prefetch=0,
            grid=(n_rows // rt, n_k // kt),
            in_specs=[
                pl.BlockSpec((rt, kt), lambda i, k: (i, k)),            # A tile
                pl.BlockSpec((kt, in_dim), lambda i, k: (k, 0)),        # X tile
                pl.BlockSpec((in_dim, out_pad), lambda i, k: (0, 0)),   # W (resident)
                pl.BlockSpec((1, out_pad), lambda i, k: (0, 0)),        # bias (resident)
            ],
            out_specs=pl.BlockSpec((rt, out_pad), lambda i, k: (i, 0)),
        ),
        compiler_params=pltpu.CompilerParams(
            # rows shard across TensorCores (megacore); k is a reduction.
            dimension_semantics=("parallel", "arbitrary"),
            vmem_limit_bytes=plan["vmem_limit_bytes"],
        ),
    )(adj_p, x_p, w_p, b_p)

    return out[:N, :out_dim]


def init_gcn_params(key, input_dim, output_dim, use_bias=True):
    """Parameter init mirroring the PyTorch module.

    kaiming_uniform_ (a=0, fan_in mode): bound = sqrt(6 / fan_in), where
    torch's fan_in for a (input_dim, output_dim) tensor is output_dim.
    """
    fan_in = output_dim
    bound = math.sqrt(6.0 / fan_in)
    weight = jax.random.uniform(
        key, (input_dim, output_dim), jnp.float32, minval=-bound, maxval=bound
    )
    bias = jnp.zeros((output_dim,), jnp.float32) if use_bias else None
    return weight, bias


if __name__ == "__main__":
    key = jax.random.PRNGKey(0)
    k_adj, k_x, k_w = jax.random.split(key, 3)

    # Small shapes consistent with the forward pass.
    N = 256           # number of graph nodes
    input_dim = 64    # node input feature dim
    output_dim = 128  # output feature dim

    # Synthetic "normalized Laplacian"-like dense adjacency: random graph
    # with self loops, symmetrically normalized.
    a = (jax.random.uniform(k_adj, (N, N)) < 0.05).astype(jnp.float32)
    a = jnp.maximum(a, a.T) + jnp.eye(N, dtype=jnp.float32)
    deg = jnp.sum(a, axis=1)
    d_inv_sqrt = 1.0 / jnp.sqrt(deg)
    adjacency = a * d_inv_sqrt[:, None] * d_inv_sqrt[None, :]

    input_feature = jax.random.normal(k_x, (N, input_dim), jnp.float32)
    weight, bias = init_gcn_params(k_w, input_dim, output_dim, use_bias=True)

    # Build the plan once and pre-pad/cast the adjacency once (reused across
    # layers/steps in a real GCN).
    plan = gcn_plan(N, input_dim, output_dim)
    adj_prepared = prepare_adjacency(adjacency, plan)

    out = graph_convolution(adj_prepared, input_feature, weight, bias, plan=plan)
    out = jax.block_until_ready(out)

    # Reference check in plain JAX (f32). Adjacency/support feed the MXU in
    # bf16 (f32 accumulation), so tolerance is loosened accordingly.
    ref = adjacency @ (input_feature @ weight) + bias[None, :]
    assert out.shape == (N, output_dim)
    assert jnp.allclose(out, ref, atol=5e-2, rtol=5e-2), float(
        jnp.max(jnp.abs(out - ref))
    )

    print("KERNEL_OK")
</pallas_src>

<mosaic_0001>
module attributes {stable_mosaic.version = 11 : i64} {
  func.func @_gcn_fused_kernel(%arg0: i32, %arg1: i32, %arg2: memref<256x256xbf16, #tpu.memory_space<vmem>>, %arg3: memref<256x64xf32, #tpu.memory_space<vmem>>, %arg4: memref<64x128xf32, #tpu.memory_space<vmem>>, %arg5: memref<1x128xf32, #tpu.memory_space<vmem>>, %arg6: memref<256x128xf32, #tpu.memory_space<vmem>>) attributes {dimension_semantics = [#tpu.dimension_semantics<parallel>, #tpu.dimension_semantics<arbitrary>], iteration_bounds = array<i64: 1, 1>, scalar_prefetch = 0 : i64, scratch_operands = 0 : i64, tpu.core_type = #tpu.core_type<tc>, window_params = [{transform_indices = @transform_0, window_bounds = array<i64: 256, 256>}, {transform_indices = @transform_1, window_bounds = array<i64: 256, 64>}, {pipeline_mode = #tpu.pipeline_mode<synchronous>, transform_indices = @transform_2, window_bounds = array<i64: 64, 128>}, {pipeline_mode = #tpu.pipeline_mode<synchronous>, transform_indices = @transform_3, window_bounds = array<i64: 1, 128>}, {transform_indices = @transform_4, window_bounds = array<i64: 256, 128>}]} {
    %c0_i32 = arith.constant 0 : i32
    %0 = arith.cmpi eq, %arg1, %c0_i32 : i32
    %1 = arith.extui %0 : i1 to i32
    %c0_i32_0 = arith.constant 0 : i32
    %2 = arith.cmpi ne, %1, %c0_i32_0 : i32
    scf.if %2 {
      %c0_11 = arith.constant 0 : index
      %c0_12 = arith.constant 0 : index
      %12 = vector.load %arg5[%c0_11, %c0_12] : memref<1x128xf32, #tpu.memory_space<vmem>>, vector<1x128xf32>
      %13 = vector.shape_cast %12 : vector<1x128xf32> to vector<1x128xf32>
      %14 = vector.broadcast %13 : vector<1x128xf32> to vector<256x128xf32>
      %c0_13 = arith.constant 0 : index
      %c0_14 = arith.constant 0 : index
      %15 = vector.load %arg6[%c0_13, %c0_14] : memref<256x128xf32, #tpu.memory_space<vmem>>, vector<256x128xf32>
      tpu.vector_store %arg6[%c0_13, %c0_14], %14 {strides = array<i32>} : memref<256x128xf32, #tpu.memory_space<vmem>>, vector<256x128xf32>,
    } else {
    }
    %c0 = arith.constant 0 : index
    %c0_1 = arith.constant 0 : index
    %3 = vector.load %arg3[%c0, %c0_1] : memref<256x64xf32, #tpu.memory_space<vmem>>, vector<256x64xf32>
    %c0_2 = arith.constant 0 : index
    %c0_3 = arith.constant 0 : index
    %4 = vector.load %arg4[%c0_2, %c0_3] : memref<64x128xf32, #tpu.memory_space<vmem>>, vector<64x128xf32>
    %cst = arith.constant dense<0.000000e+00> : vector<256x128xf32>
    %5 = tpu.matmul %3, %4, %cst {dimension_numbers = #tpu.dot_dimension_numbers<[1], [0], [0], [1], [0, 0, 1, 1], [], []>} : vector<256x64xf32>, vector<64x128xf32>, vector<256x128xf32> -> vector<256x128xf32>
    %c0_4 = arith.constant 0 : index
    %c0_5 = arith.constant 0 : index
    %6 = vector.load %arg6[%c0_4, %c0_5] : memref<256x128xf32, #tpu.memory_space<vmem>>, vector<256x128xf32>
    %c0_6 = arith.constant 0 : index
    %c0_7 = arith.constant 0 : index
    %7 = vector.load %arg2[%c0_6, %c0_7] : memref<256x256xbf16, #tpu.memory_space<vmem>>, vector<256x256xbf16>
    %8 = arith.truncf %5 : vector<256x128xf32> to vector<256x128xbf16>
    %cst_8 = arith.constant dense<0.000000e+00> : vector<256x128xf32>
    %9 = tpu.matmul %7, %8, %cst_8 {dimension_numbers = #tpu.dot_dimension_numbers<[1], [0], [0], [1], [0, 0, 1, 1], [], []>} : vector<256x256xbf16>, vector<256x128xbf16>, vector<256x128xf32> -> vector<256x128xf32>
    %10 = arith.addf %6, %9 : vector<256x128xf32>
    %c0_9 = arith.constant 0 : index
    %c0_10 = arith.constant 0 : index
    %11 = vector.load %arg6[%c0_9, %c0_10] : memref<256x128xf32, #tpu.memory_space<vmem>>, vector<256x128xf32>
    tpu.vector_store %arg6[%c0_9, %c0_10], %10 {strides = array<i32>} : memref<256x128xf32, #tpu.memory_space<vmem>>, vector<256x128xf32>,
    return
  }
  func.func @transform_0(%arg0: i32, %arg1: i32) -> (i32, i32) {
    %c0_i32 = arith.constant 0 : i32
    return %arg0, %arg1 : i32, i32
  }
  func.func @transform_1(%arg0: i32, %arg1: i32) -> (i32, i32) {
    %c0_i32 = arith.constant 0 : i32
    %c0_i32_0 = arith.constant 0 : i32
    return %arg1, %c0_i32 : i32, i32
  }
  func.func @transform_2(%arg0: i32, %arg1: i32) -> (i32, i32) {
    %c0_i32 = arith.constant 0 : i32
    %c0_i32_0 = arith.constant 0 : i32
    %c0_i32_1 = arith.constant 0 : i32
    return %c0_i32, %c0_i32_0 : i32, i32
  }
  func.func @transform_3(%arg0: i32, %arg1: i32) -> (i32, i32) {
    %c0_i32 = arith.constant 0 : i32
    %c0_i32_0 = arith.constant 0 : i32
    %c0_i32_1 = arith.constant 0 : i32
    return %c0_i32, %c0_i32_0 : i32, i32
  }
  func.func @transform_4(%arg0: i32, %arg1: i32) -> (i32, i32) {
    %c0_i32 = arith.constant 0 : i32
    %c0_i32_0 = arith.constant 0 : i32
    return %arg0, %c0_i32 : i32, i32
  }
}

</mosaic_0001>

<bundles_post_ra>
// kernel: tpu_custom_call.1
= control target key start
LH: loop header
LB: loop body
LE: loop exit
PB: predicated region body
PF: predicated region fallthrough
CT: control target
= control target key end

     0   :  { %vm102_vm0 = vcmask 523264   ;;  %s1618_s0 = inlined_call_operand.vmem [shape: bf16[256,256], index: 0, kind: input, shape index: {}]   ;;  %s1619_s1 = inlined_call_operand.vmem [shape: f32[256,64], index: 1, kind: input, shape index: {}]   ;;  %s1620_s2 = inlined_call_operand.vmem [shape: f32[64,128], index: 2, kind: input, shape index: {}]   ;;  %s1621_s3 = inlined_call_operand.vmem [shape: f32[1,128], index: 3, kind: input, shape index: {}]   ;;  %s1622_s4 = inlined_call_operand.hbm [shape: f32[256,128], index: 4, kind: output, shape index: {}]  }
   0x1   :  { %v94_v0 = vld [vmem:[%s1620_s2] sm:$0xff]  ;;  %v95_v1 = vld [vmem:[%s1620_s2 + $0x8] sm:$0xff]  ;;  %v96_v2 = vld [vmem:[%s1620_s2 + $0x10] sm:$0xff] }
   0x2   :  { %v1186_v3 = vpack.c.bf16 %v95_v1, %v94_v0  ;;  %v97_v4 = vld [vmem:[%s1620_s2 + $0x18] sm:$0xff]  ;;  %v98_v6 = vld [vmem:[%s1620_s2 + $0x20] sm:$0xff]  ;;  %v99_v7 = vld [vmem:[%s1620_s2 + $0x28] sm:$0xff] }
   0x3   :  { %v1190_v5 = vpack.c.bf16 %v97_v4, %v96_v2  ;;  %v62_v8 = vld [vmem:[%s1619_s1] sm:$0xff]  ;;  %v1194_v9 = vpack.c.bf16 %v99_v7, %v98_v6  ;;  %v100_v10 = vld [vmem:[%s1620_s2 + $0x30] sm:$0xff]  ;;  %v101_v11 = vld [vmem:[%s1620_s2 + $0x38] sm:$0xff] }
   0x4   :  { %1187 = vmatprep.subr.bf16.mxu0 %v1186_v3  ;;  %1138 = vmatprep.mubr.msk.f32.mxu0 %vm102_vm0, %v62_v8  ;;  %v1198_v12 = vpack.c.bf16 %v101_v11, %v100_v10  ;;  %v63_v13 = vld [vmem:[%s1619_s1 + $0x8] sm:$0xff]  ;;  %v64_v14 = vld [vmem:[%s1619_s1 + $0x10] sm:$0xff]  ;;  %v65_v15 = vld [vmem:[%s1619_s1 + $0x18] sm:$0xff] }
   0x5   :  { %1189 = vmatpush3.bf16.msra.mxu0 %v1186_v3  ;;  %v66_v16 = vld [vmem:[%s1619_s1 + $0x20] sm:$0xff]  ;;  %v67_v17 = vld [vmem:[%s1619_s1 + $0x28] sm:$0xff] }
   0x6   :  { %1191 = vmatprep.subr.bf16.mxu0 %v1190_v5 }
   0x9   :  { %1193 = vmatpush3.bf16.msra.mxu0 %v1190_v5 }
   0xa   :  { %1195 = vmatprep.subr.bf16.mxu0 %v1194_v9 }
   0xd   :  { %1197 = vmatpush3.bf16.msra.mxu0 %v1194_v9 }
   0xe   :  { %1199 = vmatprep.subr.bf16.mxu0 %v1198_v12 }
  0x11   :  { %1201 = vmatpush3.bf16.msra.mxu0 %v1198_v12 }
  0x14   :  { %1139 = vmatmul.mubr.msk.f32.vlgmr.msra.gmra.mrb[0].mxu0 %vm102_vm0, %v63_v13 }
  0x15   :  { %1141 = vmatprep.mubr.msk.f32.mxu0 %vm102_vm0, %v64_v14 }
  0x18   :  { %1142 = vmatmul.mubr.msk.f32.gmra.mrb[2].mxu0 %vm102_vm0, %v65_v15 }
  0x19   :  { %1144 = vmatprep.mubr.msk.f32.mxu0 %vm102_vm0, %v66_v16 }
  0x1a   :  { %9 = vsyncpa [#allocation3], 0  ;;  %v68_v18 = vld [vmem:[%s1619_s1 + $0x30] sm:$0xff]  ;;  %v69_v19 = vld [vmem:[%s1619_s1 + $0x38] sm:$0xff] }
  0x1b   :  { %v70_v20 = vld [vmem:[%s1619_s1 + $0x40] sm:$0xff]  ;;  %v71_v21 = vld [vmem:[%s1619_s1 + $0x48] sm:$0xff]  ;;  %v72_v22 = vld [vmem:[%s1619_s1 + $0x50] sm:$0xff] }
  0x1c   :  { %1145 = vmatmul.mubr.msk.f32.gmra.mrb[4].mxu0 %vm102_vm0, %v67_v17  ;;  %v73_v23 = vld [vmem:[%s1619_s1 + $0x58] sm:$0xff]  ;;  %v74_v24 = vld [vmem:[%s1619_s1 + $0x60] sm:$0xff]  ;;  %v75_v25 = vld [vmem:[%s1619_s1 + $0x68] sm:$0xff] }
  0x1d   :  { %1147 = vmatprep.mubr.msk.f32.mxu0 %vm102_vm0, %v68_v18  ;;  %v76_v26 = vld [vmem:[%s1619_s1 + $0x70] sm:$0xff]  ;;  %v77_v27 = vld [vmem:[%s1619_s1 + $0x78] sm:$0xff]  ;;  %v78_v28 = vld [vmem:[%s1619_s1 + $0x80] sm:$0xff] }
  0x1e   :  { %v79_v29 = vld [vmem:[%s1619_s1 + $0x88] sm:$0xff]  ;;  %v80_v30 = vld [vmem:[%s1619_s1 + $0x90] sm:$0xff]  ;;  %v81_v31 = vld [vmem:[%s1619_s1 + $0x98] sm:$0xff] }
  0x1f   :  { %v82_v32 = vld [vmem:[%s1619_s1 + $0xa0] sm:$0xff]  ;;  %v83_v33 = vld [vmem:[%s1619_s1 + $0xa8] sm:$0xff]  ;;  %v84_v34 = vld [vmem:[%s1619_s1 + $0xb0] sm:$0xff] }
  0x20   :  { %1148 = vmatmul.mubr.msk.f32.gmra.mrb[6].mxu0 %vm102_vm0, %v69_v19  ;;  %v85_v35 = vld [vmem:[%s1619_s1 + $0xb8] sm:$0xff]  ;;  %v86_v36 = vld [vmem:[%s1619_s1 + $0xc0] sm:$0xff]  ;;  %v87_v37 = vld [vmem:[%s1619_s1 + $0xc8] sm:$0xff] }
  0x21   :  { %1150 = vmatprep.mubr.msk.f32.mxu0 %vm102_vm0, %v70_v20  ;;  %v88_v38 = vld [vmem:[%s1619_s1 + $0xd0] sm:$0xff]  ;;  %v89_v39 = vld [vmem:[%s1619_s1 + $0xd8] sm:$0xff]  ;;  %v90_v40 = vld [vmem:[%s1619_s1 + $0xe0] sm:$0xff] }
  0x22   :  { %v91_v41 = vld [vmem:[%s1619_s1 + $0xe8] sm:$0xff]  ;;  %v92_v42 = vld [vmem:[%s1619_s1 + $0xf0] sm:$0xff]  ;;  %v93_v43 = vld [vmem:[%s1619_s1 + $0xf8] sm:$0xff] }
  0x23   :  { %v1223_v44 = vld [vmem:[%s1618_s0 + $0x54] ss:$8 sps:$4 sm:$0xff]   ;;  %v1241_v45 = vld [vmem:[%s1618_s0 + $0x4] ss:$8 sps:$4 sm:$0xff]  }
  0x24   :  { %1151 = vmatmul.mubr.msk.f32.gmra.mrb[8].mxu0 %vm102_vm0, %v71_v21  ;;  %736 = vmatprep.mubr.bf16.mxu1 %v1223_v44  ;;  %v1233_v44 = vld [vmem:[%s1618_s0 + $0x94] ss:$8 sps:$4 sm:$0xff]  }
  0x25   :  { %1153 = vmatprep.mubr.msk.f32.mxu0 %vm102_vm0, %v72_v22 }
  0x28   :  { %1154 = vmatmul.mubr.msk.f32.gmra.mrb[10].mxu0 %vm102_vm0, %v73_v23 }
  0x29   :  { %1156 = vmatprep.mubr.msk.f32.mxu0 %vm102_vm0, %v74_v24 }
  0x2c   :  { %1157 = vmatmul.mubr.msk.f32.gmra.mrb[12].mxu0 %vm102_vm0, %v75_v25 }
  0x2d   :  { %1159 = vmatprep.mubr.msk.f32.mxu0 %vm102_vm0, %v76_v26 }
  0x30   :  { %1160 = vmatmul.mubr.msk.f32.gmra.mrb[14].mxu0 %vm102_vm0, %v77_v27 }
  0x31   :  { %1162 = vmatprep.mubr.msk.f32.mxu0 %vm102_vm0, %v78_v28 }
  0x34   :  { %1163 = vmatmul.mubr.msk.f32.gmra.mrb[16].mxu0 %vm102_vm0, %v79_v29 }
  0x35   :  { %1165 = vmatprep.mubr.msk.f32.mxu0 %vm102_vm0, %v80_v30  ;;  %v1221_v30 = vld [vmem:[%s1618_s0 + $0x50] ss:$8 sps:$4 sm:$0xff]  }
  0x38   :  { %1166 = vmatmul.mubr.msk.f32.gmra.mrb[18].mxu0 %vm102_vm0, %v81_v31  ;;  %v1239_v31 = vld [vmem:[%s1618_s0] ss:$8 sps:$4 sm:$0xff]  }
  0x39   :  { %1168 = vmatprep.mubr.msk.f32.mxu0 %vm102_vm0, %v82_v32  ;;  %v1224_v32 = vld [vmem:[%s1618_s0 + $0x64] ss:$8 sps:$4 sm:$0xff]  }
  0x3c   :  { %1169 = vmatmul.mubr.msk.f32.gmra.mrb[20].mxu0 %vm102_vm0, %v83_v33  ;;  %v1245_v33 = vld [vmem:[%s1618_s0 + $0x14] ss:$8 sps:$4 sm:$0xff]  }
  0x3d   :  { %1171 = vmatprep.mubr.msk.f32.mxu0 %vm102_vm0, %v84_v34  ;;  %v1226_v34 = vld [vmem:[%s1618_s0 + $0x60] ss:$8 sps:$4 sm:$0xff]  }
  0x40   :  { %1172 = vmatmul.mubr.msk.f32.gmra.mrb[22].mxu0 %vm102_vm0, %v85_v35  ;;  %v1247_v35 = vld [vmem:[%s1618_s0 + $0x10] ss:$8 sps:$4 sm:$0xff]  }
  0x41   :  { %1174 = vmatprep.mubr.msk.f32.mxu0 %vm102_vm0, %v86_v36  ;;  %v1227_v36 = vld [vmem:[%s1618_s0 + $0x74] ss:$8 sps:$4 sm:$0xff]  }
  0x44   :  { %1175 = vmatmul.mubr.msk.f32.gmra.mrb[24].mxu0 %vm102_vm0, %v87_v37  ;;  %v1251_v37 = vld [vmem:[%s1618_s0 + $0x24] ss:$8 sps:$4 sm:$0xff]  }
  0x45   :  { %1177 = vmatprep.mubr.msk.f32.mxu0 %vm102_vm0, %v88_v38  ;;  %v1229_v38 = vld [vmem:[%s1618_s0 + $0x70] ss:$8 sps:$4 sm:$0xff]  }
  0x48   :  { %1178 = vmatmul.mubr.msk.f32.gmra.mrb[26].mxu0 %vm102_vm0, %v89_v39  ;;  %v1253_v39 = vld [vmem:[%s1618_s0 + $0x20] ss:$8 sps:$4 sm:$0xff]  }
  0x49   :  { %1180 = vmatprep.mubr.msk.f32.mxu0 %vm102_vm0, %v90_v40  ;;  %v1230_v40 = vld [vmem:[%s1618_s0 + $0x84] ss:$8 sps:$4 sm:$0xff]  }
  0x4c   :  { %1181 = vmatmul.mubr.msk.f32.gmra.mrb[28].mxu0 %vm102_vm0, %v91_v41  ;;  %v1257_v41 = vld [vmem:[%s1618_s0 + $0x34] ss:$8 sps:$4 sm:$0xff]  }
  0x4d   :  { %1183 = vmatprep.mubr.msk.f32.mxu0 %vm102_vm0, %v92_v42  ;;  %v1232_v42 = vld [vmem:[%s1618_s0 + $0x80] ss:$8 sps:$4 sm:$0xff]  }
  0x50   :  { %1184 = vmatmul.mubr.msk.f32.gmra.mrb[30].mxu0 %vm102_vm0, %v93_v43  ;;  %v1259_v43 = vld [vmem:[%s1618_s0 + $0x30] ss:$8 sps:$4 sm:$0xff]  }
  0x51   :  { %696 = vmatprep.mubr.bf16.mxu0 %v1241_v45  ;;  %v1263_v45 = vld [vmem:[%s1618_s0 + $0x44] ss:$8 sps:$4 sm:$0xff]  }
  0xe7   :  { %v1140_v46 = vpop.f32.mrb[0].mxu0 }
  0xe8   :  { %v265_v47 = vpop.f32.mrb[1].mxu0 }
  0xe9   :  { %v488_v48 = vpack.c.bf16 %v1140_v46, %v265_v47  ;;  %v1235_v46 = vld [vmem:[%s1618_s0 + $0x90] ss:$8 sps:$4 sm:$0xff]   ;;  %v1265_v47 = vld [vmem:[%s1618_s0 + $0x40] ss:$8 sps:$4 sm:$0xff]  }
  0xeb   :  { %v1143_v49 = vpop.f32.mrb[2].mxu0 }
  0xec   :  { %v275_v50 = vpop.f32.mrb[3].mxu0 }
  0xed   :  { %v489_v51 = vpack.c.bf16 %v1143_v49, %v275_v50  ;;  %v1238_v49 = vld [vmem:[%s1618_s0 + $0xa0] ss:$8 sps:$4 sm:$0xff]   ;;  %v1242_v50 = vld [vmem:[%s1618_s0 + $0xb4] ss:$8 sps:$4 sm:$0xff]  }
  0xef   :  { %v1146_v52 = vpop.f32.mrb[4].mxu0 }
  0xf0   :  { %v285_v53 = vpop.f32.mrb[5].mxu0 }
  0xf1   :  { %v490_v54 = vpack.c.bf16 %v1146_v52, %v285_v53  ;;  %v1248_v52 = vld [vmem:[%s1618_s0 + $0xc4] ss:$8 sps:$4 sm:$0xff]   ;;  %v1250_v53 = vld [vmem:[%s1618_s0 + $0xc0] ss:$8 sps:$4 sm:$0xff]  }
  0xf3   :  { %v1149_v55 = vpop.f32.mrb[6].mxu0 }
  0xf4   :  { %v295_v56 = vpop.f32.mrb[7].mxu0 }
  0xf5   :  { %v491_v57 = vpack.c.bf16 %v1149_v55, %v295_v56  ;;  %v1256_v55 = vld [vmem:[%s1618_s0 + $0xd0] ss:$8 sps:$4 sm:$0xff]   ;;  %v1260_v56 = vld [vmem:[%s1618_s0 + $0xe4] ss:$8 sps:$4 sm:$0xff]  }
  0xf7   :  { %v1152_v58 = vpop.f32.mrb[8].mxu0 }
  0xf8   :  { %v305_v59 = vpop.f32.mrb[9].mxu0 }
  0xf9   :  { %v492_v60 = vpack.c.bf16 %v1152_v58, %v305_v59  ;;  %v1266_v58 = vld [vmem:[%s1618_s0 + $0xf4] ss:$8 sps:$4 sm:$0xff]   ;;  %v1268_v59 = vld [vmem:[%s1618_s0 + $0xf0] ss:$8 sps:$4 sm:$0xff]  }
  0xfb   :  { %v1155_v61 = vpop.f32.mrb[10].mxu0 }
  0xfc   :  { %v315_v62 = vpop.f32.mrb[11].mxu0 }
  0xfd   :  { %v493_v63 = vpack.c.bf16 %v1155_v61, %v315_v62  ;;  %v1572_v62 = vld [vmem:[%s1621_s3] ss:$0 sm:$0xff] }
  0xff   :  { %v1158_v0 = vpop.f32.mrb[12].mxu0 }
 0x100   :  { %v325_v1 = vpop.f32.mrb[13].mxu0 }
 0x101   :  { %v494_v2 = vpack.c.bf16 %v1158_v0, %v325_v1 }
 0x103   :  { %v1161_v3 = vpop.f32.mrb[14].mxu0 }
 0x104   :  { %v335_v4 = vpop.f32.mrb[15].mxu0 }
 0x105   :  { %v495_v5 = vpack.c.bf16 %v1161_v3, %v335_v4 }
 0x107   :  { %v1164_v6 = vpop.f32.mrb[16].mxu0 }
 0x108   :  { %v345_v7 = vpop.f32.mrb[17].mxu0 }
 0x109   :  { %v496_v8 = vpack.c.bf16 %v1164_v6, %v345_v7 }
 0x10b   :  { %v1167_v9 = vpop.f32.mrb[18].mxu0  ;;  %1010 = vmatprep.subr.bf16.mxu0 %v496_v8  ;;  %1202 = vmatprep.subr.bf16.mxu1 %v496_v8 }
 0x10c   :  { %v355_v10 = vpop.f32.mrb[19].mxu0  ;;  %1011 = vmatpush3.bf16.msra.mxu0 %v488_v48  ;;  %1210 = vmatpush3.bf16.msra.mxu1 %v488_v48  ;;  %v1236_v48 = vld [vmem:[%s1618_s0 + $0xa4] ss:$8 sps:$4 sm:$0xff]  }
 0x10d   :  { %v497_v11 = vpack.c.bf16 %v1167_v9, %v355_v10 }
 0x10f   :  { %v1170_v12 = vpop.f32.mrb[20].mxu0  ;;  %1012 = vmatprep.subr.bf16.mxu0 %v497_v11  ;;  %1203 = vmatprep.subr.bf16.mxu1 %v497_v11 }
 0x110   :  { %v365_v13 = vpop.f32.mrb[21].mxu0  ;;  %1013 = vmatpush3.bf16.msra.mxu0 %v489_v51  ;;  %1211 = vmatpush3.bf16.msra.mxu1 %v489_v51  ;;  %v1244_v51 = vld [vmem:[%s1618_s0 + $0xb0] ss:$8 sps:$4 sm:$0xff]  }
 0x111   :  { %v498_v14 = vpack.c.bf16 %v1170_v12, %v365_v13 }
 0x113   :  { %v1173_v15 = vpop.f32.mrb[22].mxu0  ;;  %1014 = vmatprep.subr.bf16.mxu0 %v498_v14  ;;  %1204 = vmatprep.subr.bf16.mxu1 %v498_v14 }
 0x114   :  { %v375_v16 = vpop.f32.mrb[23].mxu0  ;;  %1015 = vmatpush3.bf16.msra.mxu0 %v490_v54  ;;  %1212 = vmatpush3.bf16.msra.mxu1 %v490_v54  ;;  %v1254_v54 = vld [vmem:[%s1618_s0 + $0xd4] ss:$8 sps:$4 sm:$0xff]  }
 0x115   :  { %v499_v17 = vpack.c.bf16 %v1173_v15, %v375_v16 }
 0x117   :  { %v1176_v18 = vpop.f32.mrb[24].mxu0  ;;  %1016 = vmatprep.subr.bf16.mxu0 %v499_v17  ;;  %1205 = vmatprep.subr.bf16.mxu1 %v499_v17 }
 0x118   :  { %v385_v19 = vpop.f32.mrb[25].mxu0  ;;  %1017 = vmatpush3.bf16.msra.mxu0 %v491_v57  ;;  %1213 = vmatpush3.bf16.msra.mxu1 %v491_v57  ;;  %v1262_v57 = vld [vmem:[%s1618_s0 + $0xe0] ss:$8 sps:$4 sm:$0xff]   ;;  %s1293_s0 = smov [#allocation2]  }
 0x119   :  { %v500_v20 = vpack.c.bf16 %v1176_v18, %v385_v19  ;;  %s894_s3 = sshll.u32 %s1293_s0, 4  ;;  %s895_s3 = int_to_ptr.vmem [resolvable:$true] %s894_s3 }
 0x11a   :  { %s1269_s23 = scalar_lea.vmem %s895_s3, 4096  ;;  %p1274_p1 = scmp.lt.s32.totalorder %s895_s3, %s895_s3 }
 0x11b   :  { %v1179_v21 = vpop.f32.mrb[26].mxu0  ;;  %1018 = vmatprep.subr.bf16.mxu0 %v500_v20  ;;  %1206 = vmatprep.subr.bf16.mxu1 %v500_v20  ;;  %p1270_p0 = scmp.ne.s32.totalorder %s895_s3, %s1269_s23  ;;  %p1275_p2 = scmp.lt.s32.totalorder %s1269_s23, %s1269_s23 }
 0x11c   :  { %v395_v22 = vpop.f32.mrb[27].mxu0  ;;  %1019 = vmatpush3.bf16.msra.mxu0 %v492_v60  ;;  %1214 = vmatpush3.bf16.msra.mxu1 %v492_v60 }
 0x11d   :  { %v501_v23 = vpack.c.bf16 %v1179_v21, %v395_v22  ;;  %p1276_p3 = por %p1275_p2, %p1274_p1 }
 0x11f   :  { %v1182_v24 = vpop.f32.mrb[28].mxu0  ;;  %1020 = vmatprep.subr.bf16.mxu0 %v501_v23  ;;  %1207 = vmatprep.subr.bf16.mxu1 %v501_v23  ;;  %p1277_p4 = pnand %p1276_p3, %p1270_p0 }
 0x120   :  { %v405_v25 = vpop.f32.mrb[29].mxu0  ;;  %1021 = vmatpush3.bf16.msra.mxu0 %v493_v63  ;;  %1215 = vmatpush3.bf16.msra.mxu1 %v493_v63 }
 0x121   :  { %v502_v26 = vpack.c.bf16 %v1182_v24, %v405_v25 }
 0x123   :  { %v1185_v27 = vpop.f32.mrb[30].mxu0  ;;  %1022 = vmatprep.subr.bf16.mxu0 %v502_v26  ;;  %1208 = vmatprep.subr.bf16.mxu1 %v502_v26 }
 0x124   :  { %v415_v28 = vpop.f32.mrb[31].mxu0  ;;  %1023 = vmatpush3.bf16.msra.mxu0 %v494_v2  ;;  %1216 = vmatpush3.bf16.msra.mxu1 %v494_v2 }
 0x125   :  { %v503_v29 = vpack.c.bf16 %v1185_v27, %v415_v28 }
 0x127   :  { %1024 = vmatprep.subr.bf16.mxu0 %v503_v29  ;;  %1209 = vmatprep.subr.bf16.mxu1 %v503_v29 }
 0x128   :  { %1025 = vmatpush3.bf16.msra.mxu0 %v495_v5  ;;  %1217 = vmatpush3.bf16.msra.mxu1 %v495_v5 }
 0x12b   :  { %737 = vmatmul.mubr.bf16.vlgmr.msra.gmra.mrb[0].mxu1 %v1221_v30  ;;  %697 = vmatmul.mubr.bf16.vlgmr.msra.gmra.mrb[32].mxu0 %v1239_v31 }
 0x12c   :  { %744 = vmatprep.mubr.bf16.mxu1 %v1224_v32  ;;  %704 = vmatprep.mubr.bf16.mxu0 %v1245_v33 }
 0x133   :  { %745 = vmatmul.mubr.bf16.gmra.mrb[4].mxu1 %v1226_v34  ;;  %705 = vmatmul.mubr.bf16.gmra.mrb[36].mxu0 %v1247_v35 }
 0x134   :  { %752 = vmatprep.mubr.bf16.mxu1 %v1227_v36  ;;  %712 = vmatprep.mubr.bf16.mxu0 %v1251_v37 }
 0x13b   :  { %753 = vmatmul.mubr.bf16.gmra.mrb[8].mxu1 %v1229_v38  ;;  %713 = vmatmul.mubr.bf16.gmra.mrb[40].mxu0 %v1253_v39 }
 0x13c   :  { %760 = vmatprep.mubr.bf16.mxu1 %v1230_v40  ;;  %720 = vmatprep.mubr.bf16.mxu0 %v1257_v41 }
 0x143   :  { %761 = vmatmul.mubr.bf16.gmra.mrb[12].mxu1 %v1232_v42  ;;  %721 = vmatmul.mubr.bf16.gmra.mrb[44].mxu0 %v1259_v43 }
 0x144   :  { %768 = vmatprep.mubr.bf16.mxu1 %v1233_v44  ;;  %728 = vmatprep.mubr.bf16.mxu0 %v1263_v45 }
 0x14b   :  { %769 = vmatmul.mubr.bf16.gmra.mrb[16].mxu1 %v1235_v46  ;;  %729 = vmatmul.mubr.bf16.gmra.mrb[48].mxu0 %v1265_v47 }
 0x14c   :  { %776 = vmatprep.mubr.bf16.mxu1 %v1236_v48 }
 0x153   :  { %777 = vmatmul.mubr.bf16.gmra.mrb[20].mxu1 %v1238_v49 }
 0x154   :  { %784 = vmatprep.mubr.bf16.mxu1 %v1242_v50 }
 0x15b   :  { %785 = vmatmul.mubr.bf16.gmra.mrb[24].mxu1 %v1244_v51 }
 0x15c   :  { %792 = vmatprep.mubr.bf16.mxu1 %v1248_v52 }
 0x163   :  { %793 = vmatmul.mubr.bf16.gmra.mrb[28].mxu1 %v1250_v53 }
 0x164   :  { %800 = vmatprep.mubr.bf16.mxu1 %v1254_v54 }
 0x16b   :  { %801 = vmatmul.mubr.bf16.gmra.mrb[32].mxu1 %v1256_v55 }
 0x16c   :  { %808 = vmatprep.mubr.bf16.mxu1 %v1260_v56 }
 0x173   :  { %809 = vmatmul.mubr.bf16.gmra.mrb[36].mxu1 %v1262_v57 }
 0x174   :  { %816 = vmatprep.mubr.bf16.mxu1 %v1266_v58 }
 0x17b   :  { %817 = vmatmul.mubr.bf16.gmra.mrb[40].mxu1 %v1268_v59 }
 0x1fe   :  { %v1056_v60 = vpop.f32.mrb[0].mxu1  ;;  %v1026_v61 = vpop.f32.mrb[32].mxu0 }
 0x1ff   :  { %v1057_v63 = vpop.f32.mrb[1].mxu1  ;;  %v1027_v0 = vpop.f32.mrb[33].mxu0 }
 0x200   :  { %v1058_v1 = vadd.f32 %v1057_v63, %v1056_v60  ;;  %v1059_v2 = vpop.f32.mrb[2].mxu1  ;;  %v1028_v3 = vadd.f32 %v1027_v0, %v1026_v61  ;;  %v1029_v4 = vpop.f32.mrb[34].mxu0 }
 0x201   :  { %v1060_v5 = vpop.f32.mrb[3].mxu1  ;;  %v1030_v6 = vpop.f32.mrb[35].mxu0 }
 0x202   :  { %v835_v7 = vadd.f32 %v1058_v1, %v1572_v62  ;;  %v1061_v8 = vadd.f32 %v1060_v5, %v1059_v2  ;;  %v825_v9 = vadd.f32 %v1028_v3, %v1572_v62  ;;  %v1031_v10 = vadd.f32 %v1030_v6, %v1029_v4 }
 0x204   :  { %867 = vst [vmem:[#allocation2 + $0x50] sm:$0xff] %v835_v7  ;;  %v836_v11 = vadd.f32 %v1061_v8, %v1572_v62  ;;  %857 = vst [vmem:[#allocation2] sm:$0xff] %v825_v9  ;;  %v826_v12 = vadd.f32 %v1031_v10, %v1572_v62 }
 0x206   :  { %868 = vst [vmem:[#allocation2 + $0x58] sm:$0xff] %v836_v11  ;;  %v1062_v13 = vpop.f32.mrb[4].mxu1  ;;  %858 = vst [vmem:[#allocation2 + $0x8] sm:$0xff] %v826_v12  ;;  %v1032_v14 = vpop.f32.mrb[36].mxu0 }
 0x207   :  { %v1063_v15 = vpop.f32.mrb[5].mxu1  ;;  %v1033_v16 = vpop.f32.mrb[37].mxu0 }
 0x208   :  { %v1064_v17 = vadd.f32 %v1063_v15, %v1062_v13  ;;  %v1065_v18 = vpop.f32.mrb[6].mxu1  ;;  %v1034_v19 = vadd.f32 %v1033_v16, %v1032_v14  ;;  %v1035_v20 = vpop.f32.mrb[38].mxu0 }
 0x209   :  { %v1066_v21 = vpop.f32.mrb[7].mxu1  ;;  %v1036_v22 = vpop.f32.mrb[39].mxu0 }
 0x20a   :  { %v837_v23 = vadd.f32 %v1064_v17, %v1572_v62  ;;  %v1067_v24 = vadd.f32 %v1066_v21, %v1065_v18  ;;  %v827_v25 = vadd.f32 %v1034_v19, %v1572_v62  ;;  %v1037_v26 = vadd.f32 %v1036_v22, %v1035_v20 }
 0x20c   :  { %869 = vst [vmem:[#allocation2 + $0x60] sm:$0xff] %v837_v23  ;;  %v838_v27 = vadd.f32 %v1067_v24, %v1572_v62  ;;  %859 = vst [vmem:[#allocation2 + $0x10] sm:$0xff] %v827_v25  ;;  %v828_v28 = vadd.f32 %v1037_v26, %v1572_v62 }
 0x20e   :  { %870 = vst [vmem:[#allocation2 + $0x68] sm:$0xff] %v838_v27  ;;  %v1068_v29 = vpop.f32.mrb[8].mxu1  ;;  %860 = vst [vmem:[#allocation2 + $0x18] sm:$0xff] %v828_v28  ;;  %v1038_v30 = vpop.f32.mrb[40].mxu0 }
 0x20f   :  { %v1069_v31 = vpop.f32.mrb[9].mxu1  ;;  %v1039_v32 = vpop.f32.mrb[41].mxu0 }
 0x210   :  { %v1070_v33 = vadd.f32 %v1069_v31, %v1068_v29  ;;  %v1071_v34 = vpop.f32.mrb[10].mxu1  ;;  %v1040_v35 = vadd.f32 %v1039_v32, %v1038_v30  ;;  %v1041_v36 = vpop.f32.mrb[42].mxu0 }
 0x211   :  { %v1072_v37 = vpop.f32.mrb[11].mxu1  ;;  %v1042_v38 = vpop.f32.mrb[43].mxu0 }
 0x212   :  { %v839_v39 = vadd.f32 %v1070_v33, %v1572_v62  ;;  %v1073_v40 = vadd.f32 %v1072_v37, %v1071_v34  ;;  %v829_v41 = vadd.f32 %v1040_v35, %v1572_v62  ;;  %v1043_v42 = vadd.f32 %v1042_v38, %v1041_v36 }
 0x214   :  { %871 = vst [vmem:[#allocation2 + $0x70] sm:$0xff] %v839_v39  ;;  %v840_v43 = vadd.f32 %v1073_v40, %v1572_v62  ;;  %861 = vst [vmem:[#allocation2 + $0x20] sm:$0xff] %v829_v41  ;;  %v830_v44 = vadd.f32 %v1043_v42, %v1572_v62 }
 0x216   :  { %872 = vst [vmem:[#allocation2 + $0x78] sm:$0xff] %v840_v43  ;;  %v1074_v45 = vpop.f32.mrb[12].mxu1  ;;  %862 = vst [vmem:[#allocation2 + $0x28] sm:$0xff] %v830_v44  ;;  %v1044_v46 = vpop.f32.mrb[44].mxu0 }
 0x217   :  { %v1075_v47 = vpop.f32.mrb[13].mxu1  ;;  %v1045_v48 = vpop.f32.mrb[45].mxu0 }
 0x218   :  { %v1076_v49 = vadd.f32 %v1075_v47, %v1074_v45  ;;  %v1077_v50 = vpop.f32.mrb[14].mxu1  ;;  %v1046_v51 = vadd.f32 %v1045_v48, %v1044_v46  ;;  %v1047_v52 = vpop.f32.mrb[46].mxu0 }
 0x219   :  { %v1078_v53 = vpop.f32.mrb[15].mxu1  ;;  %v1048_v54 = vpop.f32.mrb[47].mxu0 }
 0x21a   :  { %v841_v55 = vadd.f32 %v1076_v49, %v1572_v62  ;;  %v1079_v56 = vadd.f32 %v1078_v53, %v1077_v50  ;;  %v831_v57 = vadd.f32 %v1046_v51, %v1572_v62  ;;  %v1049_v58 = vadd.f32 %v1048_v54, %v1047_v52 }
 0x21c   :  { %873 = vst [vmem:[#allocation2 + $0x80] sm:$0xff] %v841_v55  ;;  %v842_v59 = vadd.f32 %v1079_v56, %v1572_v62  ;;  %863 = vst [vmem:[#allocation2 + $0x30] sm:$0xff] %v831_v57  ;;  %v832_v60 = vadd.f32 %v1049_v58, %v1572_v62 }
 0x21e   :  { %874 = vst [vmem:[#allocation2 + $0x88] sm:$0xff] %v842_v59  ;;  %v1080_v61 = vpop.f32.mrb[16].mxu1  ;;  %864 = vst [vmem:[#allocation2 + $0x38] sm:$0xff] %v832_v60  ;;  %v1050_v63 = vpop.f32.mrb[48].mxu0 }
 0x21f   :  { %v1081_v0 = vpop.f32.mrb[17].mxu1  ;;  %v1051_v1 = vpop.f32.mrb[49].mxu0 }
 0x220   :  { %v1082_v2 = vadd.f32 %v1081_v0, %v1080_v61  ;;  %v1083_v3 = vpop.f32.mrb[18].mxu1  ;;  %v1052_v4 = vadd.f32 %v1051_v1, %v1050_v63  ;;  %v1053_v5 = vpop.f32.mrb[50].mxu0 }
 0x221   :  { %v1084_v6 = vpop.f32.mrb[19].mxu1  ;;  %v1054_v7 = vpop.f32.mrb[51].mxu0 }
 0x222   :  { %v843_v8 = vadd.f32 %v1082_v2, %v1572_v62  ;;  %v1085_v9 = vadd.f32 %v1084_v6, %v1083_v3  ;;  %v833_v10 = vadd.f32 %v1052_v4, %v1572_v62  ;;  %v1055_v11 = vadd.f32 %v1054_v7, %v1053_v5 }
 0x224   :  { %875 = vst [vmem:[#allocation2 + $0x90] sm:$0xff] %v843_v8  ;;  %v844_v12 = vadd.f32 %v1085_v9, %v1572_v62  ;;  %865 = vst [vmem:[#allocation2 + $0x40] sm:$0xff] %v833_v10  ;;  %v834_v13 = vadd.f32 %v1055_v11, %v1572_v62 }
 0x226   :  { %876 = vst [vmem:[#allocation2 + $0x98] sm:$0xff] %v844_v12  ;;  %v1086_v14 = vpop.f32.mrb[20].mxu1  ;;  %866 = vst [vmem:[#allocation2 + $0x48] sm:$0xff] %v834_v13 }
 0x227   :  { %v1087_v15 = vpop.f32.mrb[21].mxu1 }
 0x228   :  { %v1088_v16 = vadd.f32 %v1087_v15, %v1086_v14  ;;  %v1089_v17 = vpop.f32.mrb[22].mxu1 }
 0x229   :  { %v1090_v18 = vpop.f32.mrb[23].mxu1 }
 0x22a   :  { %v845_v19 = vadd.f32 %v1088_v16, %v1572_v62  ;;  %v1091_v20 = vadd.f32 %v1090_v18, %v1089_v17 }
 0x22c   :  { %877 = vst [vmem:[#allocation2 + $0xa0] sm:$0xff] %v845_v19  ;;  %v846_v21 = vadd.f32 %v1091_v20, %v1572_v62 }
 0x22e   :  { %878 = vst [vmem:[#allocation2 + $0xa8] sm:$0xff] %v846_v21  ;;  %v1092_v22 = vpop.f32.mrb[24].mxu1 }
 0x22f   :  { %v1093_v23 = vpop.f32.mrb[25].mxu1 }
 0x230   :  { %v1094_v24 = vadd.f32 %v1093_v23, %v1092_v22  ;;  %v1095_v25 = vpop.f32.mrb[26].mxu1 }
 0x231   :  { %v1096_v26 = vpop.f32.mrb[27].mxu1 }
 0x232   :  { %v847_v27 = vadd.f32 %v1094_v24, %v1572_v62  ;;  %v1097_v28 = vadd.f32 %v1096_v26, %v1095_v25 }
 0x234   :  { %879 = vst [vmem:[#allocation2 + $0xb0] sm:$0xff] %v847_v27  ;;  %v848_v29 = vadd.f32 %v1097_v28, %v1572_v62 }
 0x236   :  { %880 = vst [vmem:[#allocation2 + $0xb8] sm:$0xff] %v848_v29  ;;  %v1098_v30 = vpop.f32.mrb[28].mxu1 }
 0x237   :  { %v1099_v31 = vpop.f32.mrb[29].mxu1 }
 0x238   :  { %v1100_v32 = vadd.f32 %v1099_v31, %v1098_v30  ;;  %v1101_v33 = vpop.f32.mrb[30].mxu1 }
 0x239   :  { %v1102_v34 = vpop.f32.mrb[31].mxu1 }
 0x23a   :  { %v849_v35 = vadd.f32 %v1100_v32, %v1572_v62  ;;  %v1103_v36 = vadd.f32 %v1102_v34, %v1101_v33 }
 0x23c   :  { %881 = vst [vmem:[#allocation2 + $0xc0] sm:$0xff] %v849_v35  ;;  %v850_v37 = vadd.f32 %v1103_v36, %v1572_v62 }
 0x23e   :  { %882 = vst [vmem:[#allocation2 + $0xc8] sm:$0xff] %v850_v37  ;;  %v1104_v38 = vpop.f32.mrb[32].mxu1 }
 0x23f   :  { %v1105_v39 = vpop.f32.mrb[33].mxu1 }
 0x240   :  { %v1106_v40 = vadd.f32 %v1105_v39, %v1104_v38  ;;  %v1107_v41 = vpop.f32.mrb[34].mxu1 }
 0x241   :  { %v1108_v42 = vpop.f32.mrb[35].mxu1 }
 0x242   :  { %v851_v43 = vadd.f32 %v1106_v40, %v1572_v62  ;;  %v1109_v44 = vadd.f32 %v1108_v42, %v1107_v41 }
 0x244   :  { %883 = vst [vmem:[#allocation2 + $0xd0] sm:$0xff] %v851_v43  ;;  %v852_v45 = vadd.f32 %v1109_v44, %v1572_v62 }
 0x246   :  { %884 = vst [vmem:[#allocation2 + $0xd8] sm:$0xff] %v852_v45  ;;  %v1110_v46 = vpop.f32.mrb[36].mxu1 }
 0x247   :  { %v1111_v47 = vpop.f32.mrb[37].mxu1 }
 0x248   :  { %v1112_v48 = vadd.f32 %v1111_v47, %v1110_v46  ;;  %v1113_v49 = vpop.f32.mrb[38].mxu1 }
 0x249   :  { %v1114_v50 = vpop.f32.mrb[39].mxu1 }
 0x24a   :  { %v853_v51 = vadd.f32 %v1112_v48, %v1572_v62  ;;  %v1115_v52 = vadd.f32 %v1114_v50, %v1113_v49 }
 0x24c   :  { %885 = vst [vmem:[#allocation2 + $0xe0] sm:$0xff] %v853_v51  ;;  %v854_v53 = vadd.f32 %v1115_v52, %v1572_v62 }
 0x24e   :  { %886 = vst [vmem:[#allocation2 + $0xe8] sm:$0xff] %v854_v53  ;;  %v1116_v54 = vpop.f32.mrb[40].mxu1 }
 0x24f   :  { %v1117_v55 = vpop.f32.mrb[41].mxu1 }
 0x250   :  { %v1118_v56 = vadd.f32 %v1117_v55, %v1116_v54  ;;  %v1119_v57 = vpop.f32.mrb[42].mxu1 }
 0x251   :  { %v1120_v58 = vpop.f32.mrb[43].mxu1 }
 0x252   :  { %v855_v59 = vadd.f32 %v1118_v56, %v1572_v62  ;;  %v1121_v60 = vadd.f32 %v1120_v58, %v1119_v57 }
 0x254   :  { %887 = vst [vmem:[#allocation2 + $0xf0] sm:$0xff] %v855_v59  ;;  %v856_v61 = vadd.f32 %v1121_v60, %v1572_v62 }
 0x256   :  { %888 = vst [vmem:[#allocation2 + $0xf8] sm:$0xff] %v856_v61 }
 0x257   :  { %1280 = shalt.err (!%p1277_p4)
}
 0x258   :  { %s1281_s26 = scalar_lea.hbm %s1622_s4, 4096 }
 0x259   :  { %p1282_p5 = scmp.ne.s32.totalorder %s1622_s4, %s1281_s26  ;;  %p1285_p6 = scmp.lt.u32.totalorder %s1281_s26, %s1622_s4 }
 0x25b   :  { %p1287_p7 = pnand %p1285_p6, %p1282_p5 }
 0x25d   :  { %1290 = shalt.err (!%p1287_p7)
}
 0x25e   :  { %s1294_s5 = smov 128   ;;  %s1295_s6 = smov 8  }
 0x25f   :  { %900 = dma.vmem_to_hbm [thread:$0]  %s895_s3, 4096, %s1622_s4, [#allocation3], %s1294_s5, %s1294_s5, %s1295_s6  }
 0x260   :  { %1291 = dma.done.wait [#allocation3], 4096  }
 0x261   :  { %1292 = vsyncadd [#allocation3], 4294963200 }
 0x262   :  { %904 = vsyncpa [#allocation3], 1 }

</bundles_post_ra>
